<compile_context>
chip_gen: v6e
topology: v6e:2x2x1
jax: 0.10.0
libtpu: 0.0.40
codegen_flags: <defaults>
</compile_context>

<pallas_src>
import jax
import jax.numpy as jnp
from jax.experimental import pallas as pl
from jax.experimental.pallas import tpu as pltpu

_NEG_INF = -1e30  # masked-score bias: exp(score - m) underflows to exactly 0.0


def _attention_kernel(len_ref, dec_ref, hids_ref, ctx_ref, attn_ref, m_ref, l_ref,
                      m_s, l_s, acc):
    tile_s, tile_b = hids_ref.shape[0], hids_ref.shape[1]
    si = pl.program_id(1)

    # ---- per-batch-tile init (first srclen tile) ------------------------------
    @pl.when(si == 0)
    def _init():
        m_s[...] = jnp.full_like(m_s, _NEG_INF)
        l_s[...] = jnp.zeros_like(l_s)
        acc[...] = jnp.zeros_like(acc)

    hids = hids_ref[...].astype(jnp.float32)           # (tile_s, tile_b, enc)
    d = dec_ref[...].astype(jnp.float32)               # (tile_b, enc)

    # scores[s, b] = sum_e hids[s, b, e] * d[b, e].  The enc reduction runs on the
    # big tensor; one tiny (tile_s, tile_b) transpose makes everything downstream
    # lane-dense (srclen on the 128-lane axis).
    scores = jnp.transpose(jnp.sum(hids * d[None, :, :], axis=2))   # (tile_b, tile_s)

    # Fused source-length mask: positions >= src_length get -inf *before* softmax
    # (identical to the reference's softmax -> mask -> renormalize).
    pos = si * tile_s + jax.lax.broadcasted_iota(jnp.int32, (tile_b, tile_s), 1)
    scores = jnp.where(pos < len_ref[...], scores, _NEG_INF)

    # Lane-dense store of unnormalized masked scores; normalized in the wrapper.
    attn_ref[...] = scores[None, :, :]

    # ---- online softmax running statistics + context accumulation -------------
    m_prev = m_s[...]                                               # (tile_b, 1)
    m_new = jnp.maximum(m_prev, jnp.max(scores, axis=1, keepdims=True))
    alpha = jnp.exp(m_prev - m_new)                                 # rescale old
    p = jnp.exp(scores - m_new)                                     # (tile_b, tile_s)
    l_s[...] = alpha * l_s[...] + jnp.sum(p, axis=1, keepdims=True)
    acc[...] = alpha * acc[...] + jnp.sum(hids * jnp.transpose(p)[:, :, None], axis=0)
    m_s[...] = m_new

    # ---- finalize on the last srclen tile --------------------------------------
    @pl.when(si == pl.num_programs(1) - 1)
    def _finalize():
        ctx_ref[...] = (acc[...] / l_s[...]).astype(ctx_ref.dtype)  # exact divide
        m_ref[...] = m_s[...]
        l_ref[...] = l_s[...]


def _vmem_capacity_bytes():
    try:
        cap = int(getattr(pltpu.get_tpu_info(), "vmem_capacity_bytes", 0))
        if cap > 0:
            return cap
    except Exception:
        pass
    return 64 * 1024 * 1024  # conservative fallback (v7x per-core VMEM)


def _choose_tiles(srclen, bsz, enc, itemsize, max_tile_s):
    # Batch tile: multiple of 8 (sublane rule) and >= 2 blocks on the "parallel"
    # axis when bsz allows it (keeps both v7x TensorCores busy).
    tile_b = 8 if (bsz % 8 == 0 and bsz > 8) else bsz

    cap_bytes = _vmem_capacity_bytes()
    budget = int(cap_bytes * 0.45)                       # tile sizing headroom
    vmem_limit = min(int(cap_bytes * 0.70), 100 * 1024 * 1024)

    # Real footprint: 2x hids block + 2x (lane-padded) attn block + dec/ctx/acc.
    fixed = 6 * tile_b * enc * 4 + (1 << 20)
    per_s = 2 * tile_b * (enc * itemsize + 4)
    cap = max(8, (budget - fixed) // per_s)
    cap = int(min(cap, max_tile_s, srclen))

    if srclen <= cap:
        return tile_b, srclen, False, vmem_limit
    # Prefer a tile_s dividing srclen exactly: avoids the jnp.pad copy of hids.
    div = 1
    for d in range(cap, 0, -1):
        if srclen % d == 0:
            div = d
            break
    if div >= max(8, cap // 4):
        return tile_b, div, False, vmem_limit
    # Fall back to a zero-padded ragged tail (copies source_hids once in wrapper).
    return tile_b, max(8, (cap // 8) * 8), True, vmem_limit


def attention_layer_forward(decoder_state, source_hids, src_lengths,
                            w_t=None, b=None, *, max_tile_s=2048):
    """decoder_state: (bsz, dec_dim); source_hids: (srclen, bsz, enc) in native
    PyTorch layout; src_lengths: (bsz,) or (bsz, 1) int.  w_t (dec_dim, enc) = W^T
    and b (enc,) are only required when dec_dim != enc.
    Returns (context (bsz, enc), attn_scores (srclen, bsz))."""
    srclen, bsz, enc = source_hids.shape
    dec_dim = decoder_state.shape[1]

    if dec_dim != enc:
        if w_t is None or b is None:
            raise ValueError("dec_dim != enc_dim requires projection weight/bias")
        # Hoisted input projection: one small XLA matmul outside the kernel.
        decoder_state = (decoder_state.astype(jnp.float32) @ w_t.astype(jnp.float32)
                         + b.astype(jnp.float32))
    dec = decoder_state

    tile_b, tile_s, needs_pad, vmem_limit = _choose_tiles(
        srclen, bsz, enc, source_hids.dtype.itemsize, max_tile_s)
    n_b = bsz // tile_b
    n_s = -(-srclen // tile_s)
    s_pad = n_s * tile_s

    hids = source_hids
    if needs_pad and s_pad != srclen:
        # Only taken when no reasonable divisor of srclen fits in VMEM; padded
        # rows are zero and fully masked by the length test below.
        hids = jnp.pad(hids, ((0, s_pad - srclen), (0, 0), (0, 0)))

    # TODO(synk): src_length == 0 rows produce a uniform average here, while the
    # PyTorch reference produces NaN (0/0); lengths >= 1 are assumed.
    lens = jnp.asarray(src_lengths, jnp.int32).reshape(bsz, 1)

    grid_spec = pltpu.PrefetchScalarGridSpec(
        num_scalar_prefetch=0,
        grid=(n_b, n_s),
        in_specs=[
            pl.BlockSpec((tile_b, 1), lambda bi, si: (bi, 0)),                # lengths
            pl.BlockSpec((tile_b, enc), lambda bi, si: (bi, 0)),              # dec state
            pl.BlockSpec((tile_s, tile_b, enc), lambda bi, si: (si, bi, 0)),  # hids
        ],
        out_specs=[
            pl.BlockSpec((tile_b, enc), lambda bi, si: (bi, 0)),              # context
            pl.BlockSpec((1, tile_b, tile_s), lambda bi, si: (si, bi, 0)),    # raw scores
            pl.BlockSpec((tile_b, 1), lambda bi, si: (bi, 0)),                # m
            pl.BlockSpec((tile_b, 1), lambda bi, si: (bi, 0)),                # l
        ],
        scratch_shapes=[
            pltpu.VMEM((tile_b, 1), jnp.float32),     # running max
            pltpu.VMEM((tile_b, 1), jnp.float32),     # running sum of exp
            pltpu.VMEM((tile_b, enc), jnp.float32),   # context accumulator
        ],
    )
    out_shape = (
        jax.ShapeDtypeStruct((bsz, enc), source_hids.dtype),
        jax.ShapeDtypeStruct((n_s, bsz, tile_s), jnp.float32),
        jax.ShapeDtypeStruct((bsz, 1), jnp.float32),
        jax.ShapeDtypeStruct((bsz, 1), jnp.float32),
    )

    ctx, attn_raw, m, l = pl.pallas_call(
        _attention_kernel,
        out_shape=out_shape,
        grid_spec=grid_spec,
        compiler_params=pltpu.CompilerParams(
            dimension_semantics=("parallel", "arbitrary"),
            vmem_limit_bytes=vmem_limit,
        ),
    )(lens, dec, hids)

    # Tiny (bsz, srclen)-sized normalization + relayout outside the kernel.
    attn = jnp.exp(attn_raw - m[None, :, :]) * (1.0 / l)[None, :, :]
    attn = attn.transpose(0, 2, 1).reshape(s_pad, bsz)[:srclen]
    return ctx, attn


def _reference(decoder_state, source_hids, src_lengths, w_t=None, b=None):
    dec = decoder_state
    if dec.shape[1] != source_hids.shape[2]:
        dec = dec @ w_t + b
    scores = jnp.sum(source_hids * dec[None, :, :], axis=2)       # (srclen, bsz)
    soft = jax.nn.softmax(scores.T, axis=-1)                      # (bsz, srclen)
    srclen = source_hids.shape[0]
    mask = (jnp.arange(srclen)[None, :] < src_lengths[:, None]).astype(soft.dtype)
    masked = soft * mask
    norm = masked / jnp.sum(masked, axis=1, keepdims=True)        # (bsz, srclen)
    ctx = jnp.sum(source_hids * norm.T[:, :, None], axis=0)       # (bsz, enc)
    return ctx, norm.T


if __name__ == "__main__":
    key = jax.random.PRNGKey(0)
    k1, k2, k3, k4, k5, k6, k7, k8 = jax.random.split(key, 8)

    # Case 1: dec_dim != enc_dim -> hoisted input projection, single srclen tile.
    bsz, srclen, dec_dim, enc = 4, 8, 48, 32
    dec_state = jax.random.normal(k1, (bsz, dec_dim), jnp.float32)
    hids = jax.random.normal(k2, (srclen, bsz, enc), jnp.float32)
    lens = jnp.array([srclen, 5, 3, srclen], jnp.int32)   # max == srclen as module asserts
    w = jax.random.uniform(k3, (enc, dec_dim), jnp.float32, -0.1, 0.1)
    bias = jax.random.uniform(k4, (enc,), jnp.float32, -0.1, 0.1)
    w_t = w.T
    ctx, attn = attention_layer_forward(dec_state, hids, lens, w_t, bias)
    jax.block_until_ready((ctx, attn))
    ctx_r, attn_r = _reference(dec_state, hids, lens, w_t, bias)
    assert ctx.shape == (bsz, enc) and attn.shape == (srclen, bsz)
    assert jnp.allclose(ctx, ctx_r, atol=2e-5, rtol=2e-5)
    assert jnp.allclose(attn, attn_r, atol=2e-5, rtol=2e-5)

    # Case 2: no projection, batch tiling (16 -> 2x8), tile_s=10 divides srclen=40
    # (no pad copy), multiple srclen tiles exercising the online softmax.
    bsz2, srclen2, enc2 = 16, 40, 32
    dec2 = jax.random.normal(k5, (bsz2, enc2), jnp.float32)
    hids2 = jax.random.normal(k6, (srclen2, bsz2, enc2), jnp.float32)
    lens2 = jnp.array([40, 1, 7, 13, 40, 25, 32, 8, 19, 40, 3, 27, 36, 11, 22, 5],
                      jnp.int32)
    ctx2, attn2 = attention_layer_forward(dec2, hids2, lens2, max_tile_s=16)
    jax.block_until_ready((ctx2, attn2))
    ctx2_r, attn2_r = _reference(dec2, hids2, lens2)
    assert ctx2.shape == (bsz2, enc2) and attn2.shape == (srclen2, bsz2)
    assert jnp.allclose(ctx2, ctx2_r, atol=2e-5, rtol=2e-5)
    assert jnp.allclose(attn2, attn2_r, atol=2e-5, rtol=2e-5)

    # Case 3: prime srclen with small tile cap -> padded ragged tail fallback.
    bsz3, srclen3, enc3 = 4, 13, 32
    dec3 = jax.random.normal(k7, (bsz3, enc3), jnp.float32)
    hids3 = jax.random.normal(k8, (srclen3, bsz3, enc3), jnp.float32)
    lens3 = jnp.array([13, 4, 1, 9], jnp.int32)
    ctx3, attn3 = attention_layer_forward(dec3, hids3, lens3, max_tile_s=8)
    jax.block_until_ready((ctx3, attn3))
    ctx3_r, attn3_r = _reference(dec3, hids3, lens3)
    assert ctx3.shape == (bsz3, enc3) and attn3.shape == (srclen3, bsz3)
    assert jnp.allclose(ctx3, ctx3_r, atol=2e-5, rtol=2e-5)
    assert jnp.allclose(attn3, attn3_r, atol=2e-5, rtol=2e-5)

    print("KERNEL_OK")
</pallas_src>

<mosaic_0001>
module attributes {stable_mosaic.version = 11 : i64} {
  func.func @_attention_kernel(%arg0: i32, %arg1: i32, %arg2: memref<4x1xi32, #tpu.memory_space<vmem>>, %arg3: memref<4x32xf32, #tpu.memory_space<vmem>>, %arg4: memref<8x4x32xf32, #tpu.memory_space<vmem>>, %arg5: memref<4x32xf32, #tpu.memory_space<vmem>>, %arg6: memref<1x4x8xf32, #tpu.memory_space<vmem>>, %arg7: memref<4x1xf32, #tpu.memory_space<vmem>>, %arg8: memref<4x1xf32, #tpu.memory_space<vmem>>, %arg9: memref<4x1xf32, #tpu.memory_space<vmem>>, %arg10: memref<4x1xf32, #tpu.memory_space<vmem>>, %arg11: memref<4x32xf32, #tpu.memory_space<vmem>>) attributes {dimension_semantics = [#tpu.dimension_semantics<parallel>, #tpu.dimension_semantics<arbitrary>], iteration_bounds = array<i64: 1, 1>, scalar_prefetch = 0 : i64, scratch_operands = 3 : i64, tpu.core_type = #tpu.core_type<tc>, window_params = [{transform_indices = @transform_0, window_bounds = array<i64: 4, 1>}, {transform_indices = @transform_1, window_bounds = array<i64: 4, 32>}, {transform_indices = @transform_2, window_bounds = array<i64: 8, 4, 32>}, {transform_indices = @transform_3, window_bounds = array<i64: 4, 32>}, {transform_indices = @transform_4, window_bounds = array<i64: 1, 4, 8>}, {transform_indices = @transform_5, window_bounds = array<i64: 4, 1>}, {transform_indices = @transform_6, window_bounds = array<i64: 4, 1>}]} {
    %c0_i32 = arith.constant 0 : i32
    %0 = arith.cmpi eq, %arg1, %c0_i32 : i32
    %1 = arith.extui %0 : i1 to i32
    %c0_i32_0 = arith.constant 0 : i32
    %2 = arith.cmpi ne, %1, %c0_i32_0 : i32
    scf.if %2 {
      %cst_28 = arith.constant -1.000000e+30 : f32
      %50 = vector.broadcast %cst_28 : f32 to vector<4x1xf32>
      %c0_29 = arith.constant 0 : index
      %c0_30 = arith.constant 0 : index
      %51 = vector.load %arg9[%c0_29, %c0_30] : memref<4x1xf32, #tpu.memory_space<vmem>>, vector<4x1xf32>
      tpu.vector_store %arg9[%c0_29, %c0_30], %50 {strides = array<i32>} : memref<4x1xf32, #tpu.memory_space<vmem>>, vector<4x1xf32>,
      %cst_31 = arith.constant 0.000000e+00 : f32
      %52 = vector.broadcast %cst_31 : f32 to vector<4x1xf32>
      %c0_32 = arith.constant 0 : index
      %c0_33 = arith.constant 0 : index
      %53 = vector.load %arg10[%c0_32, %c0_33] : memref<4x1xf32, #tpu.memory_space<vmem>>, vector<4x1xf32>
      tpu.vector_store %arg10[%c0_32, %c0_33], %52 {strides = array<i32>} : memref<4x1xf32, #tpu.memory_space<vmem>>, vector<4x1xf32>,
      %cst_34 = arith.constant 0.000000e+00 : f32
      %54 = vector.broadcast %cst_34 : f32 to vector<4x32xf32>
      %c0_35 = arith.constant 0 : index
      %c0_36 = arith.constant 0 : index
      %55 = vector.load %arg11[%c0_35, %c0_36] : memref<4x32xf32, #tpu.memory_space<vmem>>, vector<4x32xf32>
      tpu.vector_store %arg11[%c0_35, %c0_36], %54 {strides = array<i32>} : memref<4x32xf32, #tpu.memory_space<vmem>>, vector<4x32xf32>,
    } else {
    }
    %c0 = arith.constant 0 : index
    %c0_1 = arith.constant 0 : index
    %c0_2 = arith.constant 0 : index
    %3 = vector.load %arg4[%c0, %c0_1, %c0_2] : memref<8x4x32xf32, #tpu.memory_space<vmem>>, vector<8x4x32xf32>
    %c0_3 = arith.constant 0 : index
    %c0_4 = arith.constant 0 : index
    %4 = vector.load %arg3[%c0_3, %c0_4] : memref<4x32xf32, #tpu.memory_space<vmem>>, vector<4x32xf32>
    %5 = vector.shape_cast %4 : vector<4x32xf32> to vector<1x4x32xf32>
    %6 = vector.broadcast %5 : vector<1x4x32xf32> to vector<8x4x32xf32>
    %7 = arith.mulf %3, %6 : vector<8x4x32xf32>
    %cst = arith.constant dense<0.000000e+00> : vector<8x4xf32>
    %8 = vector.multi_reduction <add>, %7, %cst [2] : vector<8x4x32xf32> to vector<8x4xf32>
    %9 = tpu.transpose %8, [1, 0] : vector<8x4xf32> -> vector<4x8xf32>
    %c8_i32 = arith.constant 8 : i32
    %10 = arith.muli %arg1, %c8_i32 : i32
    %11 = tpu.iota {dimensions = array<i32: 1>} : vector<4x8xi32>
    %12 = vector.broadcast %10 : i32 to vector<4x8xi32>
    %13 = arith.addi %12, %11 : vector<4x8xi32>
    %c0_5 = arith.constant 0 : index
    %c0_6 = arith.constant 0 : index
    %14 = vector.load %arg2[%c0_5, %c0_6] : memref<4x1xi32, #tpu.memory_space<vmem>>, vector<4x1xi32>
    %15 = vector.broadcast %14 : vector<4x1xi32> to vector<4x8xi32>
    %16 = arith.cmpi slt, %13, %15 : vector<4x8xi32>
    %cst_7 = arith.constant -1.000000e+30 : f32
    %17 = vector.broadcast %cst_7 : f32 to vector<4x8xf32>
    %18 = arith.select %16, %9, %17 : vector<4x8xi1>, vector<4x8xf32>
    %19 = vector.shape_cast %18 : vector<4x8xf32> to vector<1x4x8xf32>
    %c0_8 = arith.constant 0 : index
    %c0_9 = arith.constant 0 : index
    %c0_10 = arith.constant 0 : index
    %20 = vector.load %arg6[%c0_8, %c0_9, %c0_10] : memref<1x4x8xf32, #tpu.memory_space<vmem>>, vector<1x4x8xf32>
    tpu.vector_store %arg6[%c0_8, %c0_9, %c0_10], %19 {strides = array<i32>} : memref<1x4x8xf32, #tpu.memory_space<vmem>>, vector<1x4x8xf32>,
    %c0_11 = arith.constant 0 : index
    %c0_12 = arith.constant 0 : index
    %21 = vector.load %arg9[%c0_11, %c0_12] : memref<4x1xf32, #tpu.memory_space<vmem>>, vector<4x1xf32>
    %cst_13 = arith.constant dense<0xFF800000> : vector<4xf32>
    %22 = vector.multi_reduction <maximumf>, %18, %cst_13 [1] : vector<4x8xf32> to vector<4xf32>
    %23 = vector.shape_cast %22 : vector<4xf32> to vector<4x1xf32>
    %24 = arith.maximumf %21, %23 : vector<4x1xf32>
    %25 = arith.subf %21, %24 : vector<4x1xf32>
    %26 = math.exp %25 : vector<4x1xf32>
    %27 = vector.broadcast %24 : vector<4x1xf32> to vector<4x8xf32>
    %28 = arith.subf %18, %27 : vector<4x8xf32>
    %29 = math.exp %28 : vector<4x8xf32>
    %c0_14 = arith.constant 0 : index
    %c0_15 = arith.constant 0 : index
    %30 = vector.load %arg10[%c0_14, %c0_15] : memref<4x1xf32, #tpu.memory_space<vmem>>, vector<4x1xf32>
    %31 = arith.mulf %26, %30 : vector<4x1xf32>
    %cst_16 = arith.constant dense<0.000000e+00> : vector<4xf32>
    %32 = vector.multi_reduction <add>, %29, %cst_16 [1] : vector<4x8xf32> to vector<4xf32>
    %33 = vector.shape_cast %32 : vector<4xf32> to vector<4x1xf32>
    %34 = arith.addf %31, %33 : vector<4x1xf32>
    %c0_17 = arith.constant 0 : index
    %c0_18 = arith.constant 0 : index
    %35 = vector.load %arg10[%c0_17, %c0_18] : memref<4x1xf32, #tpu.memory_space<vmem>>, vector<4x1xf32>
    tpu.vector_store %arg10[%c0_17, %c0_18], %34 {strides = array<i32>} : memref<4x1xf32, #tpu.memory_space<vmem>>, vector<4x1xf32>,
    %c0_19 = arith.constant 0 : index
    %c0_20 = arith.constant 0 : index
    %36 = vector.load %arg11[%c0_19, %c0_20] : memref<4x32xf32, #tpu.memory_space<vmem>>, vector<4x32xf32>
    %37 = vector.broadcast %26 : vector<4x1xf32> to vector<4x32xf32>
    %38 = arith.mulf %37, %36 : vector<4x32xf32>
    %39 = tpu.transpose %29, [1, 0] : vector<4x8xf32> -> vector<8x4xf32>
    %40 = vector.shape_cast %39 : vector<8x4xf32> to vector<8x4x1xf32>
    %41 = vector.broadcast %40 : vector<8x4x1xf32> to vector<8x4x32xf32>
    %42 = arith.mulf %3, %41 : vector<8x4x32xf32>
    %cst_21 = arith.constant dense<0.000000e+00> : vector<4x32xf32>
    %43 = vector.multi_reduction <add>, %42, %cst_21 [0] : vector<8x4x32xf32> to vector<4x32xf32>
    %44 = arith.addf %38, %43 : vector<4x32xf32>
    %c0_22 = arith.constant 0 : index
    %c0_23 = arith.constant 0 : index
    %45 = vector.load %arg11[%c0_22, %c0_23] : memref<4x32xf32, #tpu.memory_space<vmem>>, vector<4x32xf32>
    tpu.vector_store %arg11[%c0_22, %c0_23], %44 {strides = array<i32>} : memref<4x32xf32, #tpu.memory_space<vmem>>, vector<4x32xf32>,
    %c0_24 = arith.constant 0 : index
    %c0_25 = arith.constant 0 : index
    %46 = vector.load %arg9[%c0_24, %c0_25] : memref<4x1xf32, #tpu.memory_space<vmem>>, vector<4x1xf32>
    tpu.vector_store %arg9[%c0_24, %c0_25], %24 {strides = array<i32>} : memref<4x1xf32, #tpu.memory_space<vmem>>, vector<4x1xf32>,
    %c0_i32_26 = arith.constant 0 : i32
    %47 = arith.cmpi eq, %arg1, %c0_i32_26 : i32
    %48 = arith.extui %47 : i1 to i32
    %c0_i32_27 = arith.constant 0 : i32
    %49 = arith.cmpi ne, %48, %c0_i32_27 : i32
    scf.if %49 {
      %c0_28 = arith.constant 0 : index
      %c0_29 = arith.constant 0 : index
      %50 = vector.load %arg11[%c0_28, %c0_29] : memref<4x32xf32, #tpu.memory_space<vmem>>, vector<4x32xf32>
      %c0_30 = arith.constant 0 : index
      %c0_31 = arith.constant 0 : index
      %51 = vector.load %arg10[%c0_30, %c0_31] : memref<4x1xf32, #tpu.memory_space<vmem>>, vector<4x1xf32>
      %52 = vector.broadcast %51 : vector<4x1xf32> to vector<4x32xf32>
      %53 = arith.divf %50, %52 : vector<4x32xf32>
      %c0_32 = arith.constant 0 : index
      %c0_33 = arith.constant 0 : index
      %54 = vector.load %arg5[%c0_32, %c0_33] : memref<4x32xf32, #tpu.memory_space<vmem>>, vector<4x32xf32>
      tpu.vector_store %arg5[%c0_32, %c0_33], %53 {strides = array<i32>} : memref<4x32xf32, #tpu.memory_space<vmem>>, vector<4x32xf32>,
      %c0_34 = arith.constant 0 : index
      %c0_35 = arith.constant 0 : index
      %55 = vector.load %arg9[%c0_34, %c0_35] : memref<4x1xf32, #tpu.memory_space<vmem>>, vector<4x1xf32>
      %c0_36 = arith.constant 0 : index
      %c0_37 = arith.constant 0 : index
      %56 = vector.load %arg7[%c0_36, %c0_37] : memref<4x1xf32, #tpu.memory_space<vmem>>, vector<4x1xf32>
      tpu.vector_store %arg7[%c0_36, %c0_37], %55 {strides = array<i32>} : memref<4x1xf32, #tpu.memory_space<vmem>>, vector<4x1xf32>,
      %c0_38 = arith.constant 0 : index
      %c0_39 = arith.constant 0 : index
      %57 = vector.load %arg10[%c0_38, %c0_39] : memref<4x1xf32, #tpu.memory_space<vmem>>, vector<4x1xf32>
      %c0_40 = arith.constant 0 : index
      %c0_41 = arith.constant 0 : index
      %58 = vector.load %arg8[%c0_40, %c0_41] : memref<4x1xf32, #tpu.memory_space<vmem>>, vector<4x1xf32>
      tpu.vector_store %arg8[%c0_40, %c0_41], %57 {strides = array<i32>} : memref<4x1xf32, #tpu.memory_space<vmem>>, vector<4x1xf32>,
    } else {
    }
    return
  }
  func.func @transform_0(%arg0: i32, %arg1: i32) -> (i32, i32) {
    %c0_i32 = arith.constant 0 : i32
    %c0_i32_0 = arith.constant 0 : i32
    return %arg0, %c0_i32 : i32, i32
  }
  func.func @transform_1(%arg0: i32, %arg1: i32) -> (i32, i32) {
    %c0_i32 = arith.constant 0 : i32
    %c0_i32_0 = arith.constant 0 : i32
    return %arg0, %c0_i32 : i32, i32
  }
  func.func @transform_2(%arg0: i32, %arg1: i32) -> (i32, i32, i32) {
    %c0_i32 = arith.constant 0 : i32
    %c0_i32_0 = arith.constant 0 : i32
    return %arg1, %arg0, %c0_i32 : i32, i32, i32
  }
  func.func @transform_3(%arg0: i32, %arg1: i32) -> (i32, i32) {
    %c0_i32 = arith.constant 0 : i32
    %c0_i32_0 = arith.constant 0 : i32
    return %arg0, %c0_i32 : i32, i32
  }
  func.func @transform_4(%arg0: i32, %arg1: i32) -> (i32, i32, i32) {
    %c0_i32 = arith.constant 0 : i32
    %c0_i32_0 = arith.constant 0 : i32
    return %arg1, %arg0, %c0_i32 : i32, i32, i32
  }
  func.func @transform_5(%arg0: i32, %arg1: i32) -> (i32, i32) {
    %c0_i32 = arith.constant 0 : i32
    %c0_i32_0 = arith.constant 0 : i32
    return %arg0, %c0_i32 : i32, i32
  }
  func.func @transform_6(%arg0: i32, %arg1: i32) -> (i32, i32) {
    %c0_i32 = arith.constant 0 : i32
    %c0_i32_0 = arith.constant 0 : i32
    return %arg0, %c0_i32 : i32, i32
  }
}

</mosaic_0001>

<bundles_post_ra>
// kernel: tpu_custom_call.1
= control target key start
LH: loop header
LB: loop body
LE: loop exit
PB: predicated region body
PF: predicated region fallthrough
CT: control target
= control target key end

     0   :  { %12 = vsyncpa [#allocation6], 0  ;;  %s601_s0 = inlined_call_operand.vmem [shape: s32[4,1], index: 0, kind: input, shape index: {}]   ;;  %s602_s1 = inlined_call_operand.vmem [shape: f32[4,32], index: 1, kind: input, shape index: {}]   ;;  %s603_s2 = inlined_call_operand.hbm [shape: f32[8,4,32], index: 2, kind: input, shape index: {}]   ;;  %s604_s3 = inlined_call_operand.hbm [shape: f32[4,32], index: 3, kind: output, shape index: {0}]   ;;  %s605_s4 = inlined_call_operand.hbm [shape: f32[1,4,8], index: 4, kind: output, shape index: {1}]   ;;  %s606_s5 = inlined_call_operand.vmem [shape: f32[4,1], index: 5, kind: output, shape index: {2}]   ;;  %s607_s6 = inlined_call_operand.vmem [shape: f32[4,1], index: 6, kind: output, shape index: {3}]  }
   0x1   :  { %13 = vsyncpa [#allocation7], 0 }
   0x2   :  { %14 = vsyncpa [#allocation10], 0  ;;  %s466_s21 = smov [#allocation5]  }
   0x3   :  { %s24_s22 = sshll.u32 %s466_s21, 4  ;;  %s25_s22 = int_to_ptr.vmem [resolvable:$true] %s24_s22 }
   0x4   :  { %s408_s23 = scalar_lea.vmem %s25_s22, 512  ;;  %p413_p1 = scmp.lt.s32.totalorder %s25_s22, %s25_s22 }
   0x5   :  { %p409_p0 = scmp.ne.s32.totalorder %s25_s22, %s408_s23  ;;  %p414_p2 = scmp.lt.s32.totalorder %s408_s23, %s408_s23 }
   0x7   :  { %p415_p3 = por %p414_p2, %p413_p1 }
   0x9   :  { %p416_p4 = pnand %p415_p3, %p409_p0 }
   0xb   :  { %419 = shalt.err (!%p416_p4)
}
   0xc   :  { %s467_s24 = smov 64   ;;  %s468_s25 = smov 4  }
   0xd   :  { %30 = dma.hbm_to_vmem [thread:$0]  %s603_s2, 512, %s25_s22, [#allocation6], %s467_s24, %s467_s24, %s468_s25  }
   0xe   :  { %460 = dma.done.wait [#allocation6], 512  }
   0xf   :  { %461 = vsyncadd [#allocation6], 4294966784  ;;  %vm41_vm0 = vcmask 257024   ;;  %v512_v0 = vld [vmem:[#allocation5] sm:$0xf]  ;;  %v469_v25 = vmov 0   ;;  %v93_v27 = vlaneseq }
  0x10   :  { %v51_v1 = vld [vmem:[%s602_s1] sm:$0xf]  ;;  %v517_v2 = vld [vmem:[#allocation5 + $0x8] sm:$0xf]  ;;  %v521_v5 = vld [vmem:[#allocation5 + $0x4] sm:$0xf]  ;;  %392 = vset.pattern.permute.xlu0 %v469_v25 }
  0x11   :  { %v52_v3 = vmul.f32 %v51_v1, %v512_v0  ;;  %v54_v4 = vmul.f32 %v51_v1, %v517_v2  ;;  %v523_v6 = vld [vmem:[#allocation5 + $0xc] sm:$0xf]  ;;  %v53_v7 = vmul.f32 %v51_v1, %v521_v5  ;;  %v527_v9 = vld [vmem:[#allocation5 + $0x10] sm:$0xf]  ;;  %v529_v10 = vld [vmem:[#allocation5 + $0x14] sm:$0xf] }
  0x12   :  { %v55_v8 = vmul.f32 %v51_v1, %v523_v6  ;;  %v56_v15 = vmul.f32 %v51_v1, %v527_v9  ;;  %v57_v16 = vmul.f32 %v51_v1, %v529_v10  ;;  %v537_v17 = vld [vmem:[#allocation5 + $0x18] sm:$0xf]  ;;  %v539_v18 = vld [vmem:[#allocation5 + $0x1c] sm:$0xf]  ;;  %v177_v26 = vld [vmem:[%s601_s0] sm:$0xf] }
  0x13   :  { %v61_v11 = vsel %vm41_vm0, %v52_v3, 0.0  ;;  %v67_v12 = vsel %vm41_vm0, %v54_v4, 0.0  ;;  %v64_v13 = vsel %vm41_vm0, %v53_v7, 0.0  ;;  %v58_v21 = vmul.f32 %v51_v1, %v537_v17 }
  0x14   :  { %62 = vadd.xlane.f32.xlu0 %v61_v11  ;;  %68 = vadd.xlane.f32.xlu1 %v67_v12  ;;  %v70_v14 = vsel %vm41_vm0, %v55_v8, 0.0  ;;  %v73_v19 = vsel %vm41_vm0, %v56_v15, 0.0  ;;  %v76_v20 = vsel %vm41_vm0, %v57_v16, 0.0  ;;  %v59_v22 = vmul.f32 %v51_v1, %v539_v18 }
  0x15   :  { %v79_v23 = vsel %vm41_vm0, %v58_v21, 0.0  ;;  %v94_v28 = vand.u32 127, %v93_v27  ;;  %v550_v29 = vshrl.u32 %v93_v27, 7  ;;  %vm127_vm1 = vcmask 1041409  }
  0x16   :  { %v82_v24 = vsel %vm41_vm0, %v59_v22, 0.0  ;;  %vm129_vm2 = vcmask 1042434   ;;  %vm131_vm3 = vcmask 1043459   ;;  %vm133_vm4 = vcmask 1044484  }
  0x17   :  { %v97_v32 = vsub.s32 %v94_v28, %v550_v29  ;;  %vm135_vm5 = vcmask 1045509   ;;  %vm137_vm6 = vcmask 1046534   ;;  %vm139_vm7 = vcmask 1047559  }
  0x18   :  { %65 = vadd.xlane.f32.xlu0 %v64_v13  ;;  %71 = vadd.xlane.f32.xlu1 %v70_v14  ;;  %vm38_vm8 = vcmask 3072   ;;  %v470_v54 = vmov -1e+30   ;;  %vm183_vm10 = vcmask 60416   ;;  %v471_v59 = vmov 0.0  }
  0x19   :  { %39 = vst.msk [vmem:[#allocation2] sm:$0xf] %vm38_vm8, %v470_v54  ;;  %40 = vst.msk [vmem:[#allocation3] sm:$0xf] %vm38_vm8, %v471_v59  ;;  %v250_v21 = vsub.s32 0, %v550_v29 }
  0x1a   :  { %42 = vst.msk [vmem:[#allocation4] sm:$0xf] %vm41_vm0, %v471_v59 }
  0x1c   :  { %74 = vadd.xlane.f32.xlu0 %v73_v19  ;;  %77 = vadd.xlane.f32.xlu1 %v76_v20 }
  0x20   :  { %80 = vadd.xlane.f32.xlu0 %v79_v23  ;;  %83 = vadd.xlane.f32.xlu1 %v82_v24  ;;  %v185_v60 = vld [vmem:[#allocation2] sm:$0xf]  ;;  %v201_v14 = vld [vmem:[#allocation3] sm:$0xf]  ;;  %v257_v24 = vsub.s32 1, %v550_v29 }
  0x36   :  { %179 = vperm.xlu0 %392, %v177_v26   ;;  %v264_v26 = vsub.s32 2, %v550_v29 }
  0x9d   :  { %v63_v30 = vpop.xlane.xlu0 %62  ;;  %v69_v31 = vpop.xlane.xlu1 %68 }
  0x9e   :  { %v98_v35 = vrot.slane %v63_v30, %v97_v32  ;;  %v106_v38 = vrot.slane %v69_v31, %v97_v32  ;;  %v278_v31 = vsub.s32 4, %v550_v29 }
  0xa1   :  { %v66_v33 = vpop.xlane.xlu0 %65  ;;  %v72_v34 = vpop.xlane.xlu1 %71 }
  0xa2   :  { %v102_v36 = vrot.slane %v66_v33, %v97_v32  ;;  %v110_v37 = vrot.slane %v72_v34, %v97_v32  ;;  %v285_v33 = vsub.s32 5, %v550_v29 }
  0xa4   :  { %v128_v39 = vsel %vm127_vm1, %v102_v36, %v98_v35  ;;  %v292_v35 = vsub.s32 6, %v550_v29 }
  0xa5   :  { %v130_v40 = vsel %vm129_vm2, %v106_v38, %v128_v39  ;;  %v75_v41 = vpop.xlane.xlu0 %74  ;;  %v78_v42 = vpop.xlane.xlu1 %77 }
  0xa6   :  { %v132_v43 = vsel %vm131_vm3, %v110_v37, %v130_v40  ;;  %v114_v44 = vrot.slane %v75_v41, %v97_v32  ;;  %v118_v45 = vrot.slane %v78_v42, %v97_v32  ;;  %v299_v37 = vsub.s32 7, %v550_v29 }
  0xa8   :  { %v134_v46 = vsel %vm133_vm4, %v114_v44, %v132_v43 }
  0xa9   :  { %v81_v47 = vpop.xlane.xlu0 %80  ;;  %v84_v48 = vpop.xlane.xlu1 %83  ;;  %v136_v51 = vsel %vm135_vm5, %v118_v45, %v134_v46 }
  0xaa   :  { %v122_v49 = vrot.slane %v81_v47, %v97_v32  ;;  %v126_v50 = vrot.slane %v84_v48, %v97_v32 }
  0xac   :  { %v138_v52 = vsel %vm137_vm6, %v122_v49, %v136_v51 }
  0xad   :  { %v140_v53 = vsel %vm139_vm7, %v126_v50, %v138_v52 }
  0xae   :  { %142 = vxpose.xlu1.b32.start.end [1/1] (short) (narrow) %v140_v53, 8 }
  0xb1   :  { %v180_v55 = vpop.permute.xlu0 %179 }
  0xb2   :  { %vm181_vm9 = vcmp.lt.s32.totalorder %v94_v28, %v180_v55  ;;  %v271_v28 = vsub.s32 3, %v550_v29 }
  0xcc   :  { %393 = vset.pattern.permute.xlu1 %v469_v25 }
 0x12a   :  { %v158_v56 = vpop.trf.xlu1 }
 0x12b   :  { %v182_v57 = vsel %vm181_vm9, %v158_v56, -1e+30 }
 0x12c   :  { %v186_v58 = vsel %vm183_vm10, %v182_v57, -inf  ;;  %184 = vst.msk [vmem:[#allocation9] sm:$0xf] %vm183_vm10, %v182_v57 }
 0x12d   :  { %187 = vmax.xlane.f32.xlu0 %v186_v58 }
 0x1b6   :  { %v188_v61 = vpop.xlane.xlu0 %187 }
 0x1b7   :  { %v189_v62 = vmax.f32 %v185_v60, %v188_v61 }
 0x1b9   :  { %v190_v63 = vsub.f32 %v185_v60, %v189_v62  ;;  %329 = vst.msk [vmem:[#allocation2] sm:$0xf] %vm38_vm8, %v189_v62  ;;  %195 = vperm.xlu1 %393, %v189_v62  }
 0x1bb   :  { %v191_v1 = vmul.f32 1.442695, %v190_v63 }
 0x1bd   :  { %394 = vpow2.f32 %v191_v1 }
 0x1c0   :  { %v343_v3 = vld [vmem:[#allocation2] sm:$0xf] }
 0x1c1   :  { %344 = vst.msk [vmem:[%s606_s5] sm:$0xf] %vm38_vm8, %v343_v3 }
 0x1ca   :  { %v395_v4 = vpop.eup %394 }
 0x1cb   :  { %212 = vperm.xlu1 %393, %v395_v4   ;;  %v202_v15 = vmul.f32 %v395_v4, %v201_v14 }
 0x234   :  { %v196_v7 = vpop.permute.xlu1 %195 }
 0x235   :  { %v198_v8 = vsub.f32 %v182_v57, %v196_v7 }
 0x237   :  { %v199_v11 = vmul.f32 1.442695, %v198_v8 }
 0x239   :  { %396 = vpow2.f32 %v199_v11 }
 0x246   :  { %v397_v12 = vpop.eup %396 }
 0x247   :  { %v203_v13 = vsel %vm183_vm10, %v397_v12, 0.0 }
 0x248   :  { %204 = vadd.xlane.f32.xlu0 %v203_v13 }
 0x275   :  { %216 = vxpose.xlu0.b32.start.end [1/1] (short) (narrow) %v397_v12, 8 }
 0x2d1   :  { %v205_v16 = vpop.xlane.xlu0 %204 }
 0x2d2   :  { %v206_v19 = vadd.f32 %v205_v16, %v202_v15 }
 0x2d4   :  { %208 = vst.msk [vmem:[#allocation3] sm:$0xf] %vm38_vm8, %v206_v19 }
 0x2db   :  { %v345_v20 = vld [vmem:[#allocation3] sm:$0xf] }
 0x2dc   :  { %346 = vst.msk [vmem:[%s607_s6] sm:$0xf] %vm38_vm8, %v345_v20  ;;  %v334_v38 = vld [vmem:[#allocation3] sm:$0xf]  ;;  %s472_s6 = smov [#allocation9]  }
 0x2dd   :  { %s363_s8 = sshll.u32 %s472_s6, 4  ;;  %s364_s8 = int_to_ptr.vmem [resolvable:$true] %s363_s8 }
 0x2de   :  { %s420_s9 = scalar_lea.vmem %s364_s8, 64  ;;  %p425_p6 = scmp.lt.s32.totalorder %s364_s8, %s364_s8 }
 0x2df   :  { %p421_p5 = scmp.ne.s32.totalorder %s364_s8, %s420_s9  ;;  %p426_p7 = scmp.lt.s32.totalorder %s420_s9, %s420_s9 }
 0x2e1   :  { %p427_p8 = por %p426_p7, %p425_p6 }
 0x2e3   :  { %p428_p9 = pnand %p427_p8, %p421_p5 }
 0x2f1   :  { %v232_v22 = vpop.trf.xlu0 }
 0x2f2   :  { %v251_v23 = vrot.slane %v232_v22, %v250_v21  ;;  %v258_v25 = vrot.slane %v232_v22, %v257_v24  ;;  %v265_v27 = vrot.slane %v232_v22, %v264_v26  ;;  %v272_v30 = vrot.slane %v232_v22, %v271_v28 }
 0x2f3   :  { %v279_v32 = vrot.slane %v232_v22, %v278_v31  ;;  %v286_v34 = vrot.slane %v232_v22, %v285_v33  ;;  %v293_v36 = vrot.slane %v232_v22, %v292_v35  ;;  %v300_v39 = vrot.slane %v232_v22, %v299_v37 }
 0x2f4   :  { %253 = vbcast.lane.b32.xlu1 %v251_v23, 256 }
 0x2f8   :  { %260 = vbcast.lane.b32.xlu1 %v258_v25, 256 }
 0x2fc   :  { %267 = vbcast.lane.b32.xlu1 %v265_v27, 256 }
 0x300   :  { %274 = vbcast.lane.b32.xlu1 %v272_v30, 256 }
 0x304   :  { %281 = vbcast.lane.b32.xlu1 %v279_v32, 256 }
 0x308   :  { %288 = vbcast.lane.b32.xlu1 %v286_v34, 256 }
 0x30c   :  { %295 = vbcast.lane.b32.xlu1 %v293_v36, 256 }
 0x310   :  { %337 = vperm.xlu1 %393, %v334_v38  }
 0x314   :  { %302 = vbcast.lane.b32.xlu1 %v300_v39, 256 }
 0x315   :  { %431 = shalt.err (!%p428_p9)
}
 0x316   :  { %366 = dma.vmem_to_hbm [thread:$0]  %s364_s8, 64, %s605_s4, [#allocation10]   ;;  %v213_v40 = vpop.permute.xlu1 %212  ;;  %v209_v63 = vld [vmem:[#allocation4] sm:$0xf] }
 0x317   :  { %v215_v4 = vmul.f32 %v213_v40, %v209_v63  ;;  %s473_s4 = smov [#allocation8]  }
 0x318   :  { %s353_s12 = sshll.u32 %s473_s4, 4  ;;  %s354_s12 = int_to_ptr.vmem [resolvable:$true] %s353_s12 }
 0x319   :  { %s440_s13 = scalar_lea.vmem %s354_s12, 64  ;;  %p445_p11 = scmp.lt.s32.totalorder %s354_s12, %s354_s12 }
 0x31a   :  { %p441_p10 = scmp.ne.s32.totalorder %s354_s12, %s440_s13  ;;  %p446_p12 = scmp.lt.s32.totalorder %s440_s13, %s440_s13 }
 0x31c   :  { %p447_p13 = por %p446_p12, %p445_p11 }
 0x31e   :  { %p448_p0 = pnand %p447_p13, %p441_p10 }
 0x366   :  { %v254_v29 = vpop.permute.xlu1 %253 }
 0x367   :  { %v304_v47 = vmul.f32 %v254_v29, %v512_v0 }
 0x369   :  { %v312_v51 = vsel %vm41_vm0, %v304_v47, 0.0 }
 0x36a   :  { %v261_v41 = vpop.permute.xlu1 %260 }
 0x36b   :  { %v305_v45 = vmul.f32 %v261_v41, %v521_v5 }
 0x36d   :  { %v313_v49 = vsel %vm41_vm0, %v305_v45, 0.0 }
 0x36e   :  { %v268_v42 = vpop.permute.xlu1 %267  ;;  %v314_v54 = vadd.f32 %v313_v49, %v312_v51 }
 0x36f   :  { %v306_v48 = vmul.f32 %v268_v42, %v517_v2 }
 0x371   :  { %v315_v52 = vsel %vm41_vm0, %v306_v48, 0.0 }
 0x372   :  { %v275_v43 = vpop.permute.xlu1 %274  ;;  %v316_v57 = vadd.f32 %v315_v52, %v314_v54 }
 0x373   :  { %v307_v50 = vmul.f32 %v275_v43, %v523_v6 }
 0x375   :  { %v317_v56 = vsel %vm41_vm0, %v307_v50, 0.0 }
 0x376   :  { %v282_v44 = vpop.permute.xlu1 %281  ;;  %v318_v58 = vadd.f32 %v317_v56, %v316_v57 }
 0x377   :  { %v308_v53 = vmul.f32 %v282_v44, %v527_v9 }
 0x379   :  { %v319_v0 = vsel %vm41_vm0, %v308_v53, 0.0 }
 0x37a   :  { %v289_v46 = vpop.permute.xlu1 %288  ;;  %v320_v60 = vadd.f32 %v319_v0, %v318_v58 }
 0x37b   :  { %v309_v5 = vmul.f32 %v289_v46, %v529_v10 }
 0x37d   :  { %v321_v6 = vsel %vm41_vm0, %v309_v5, 0.0 }
 0x37e   :  { %v296_v55 = vpop.permute.xlu1 %295  ;;  %v322_v62 = vadd.f32 %v321_v6, %v320_v60 }
 0x37f   :  { %v310_v2 = vmul.f32 %v296_v55, %v537_v17 }
 0x381   :  { %v323_v61 = vsel %vm41_vm0, %v310_v2, 0.0 }
 0x382   :  { %v324_v3 = vadd.f32 %v323_v61, %v322_v62 }
 0x38b   :  { %v338_v59 = vpop.permute.xlu1 %337 }
 0x38c   :  { %398 = vrcp.f32 %v338_v59 }
 0x38f   :  { %v303_v9 = vpop.permute.xlu1 %302 }
 0x390   :  { %v311_v1 = vmul.f32 %v303_v9, %v539_v18 }
 0x392   :  { %v325_v10 = vsel %vm41_vm0, %v311_v1, 0.0 }
 0x393   :  { %v326_v7 = vadd.f32 %v325_v10, %v324_v3 }
 0x395   :  { %v327_v8 = vadd.f32 %v326_v7, %v215_v4 }
 0x397   :  { %328 = vst.msk [vmem:[#allocation4] sm:$0xf] %vm41_vm0, %v327_v8 }
 0x399   :  { %v399_v17 = vpop.eup %398 }
 0x39e   :  { %v333_v11 = vld [vmem:[#allocation4] sm:$0xf] }
 0x39f   :  { %v341_v12 = vmul.f32 %v399_v17, %v333_v11 }
 0x3a1   :  { %342 = vst.msk [vmem:[#allocation8] sm:$0xf] %vm41_vm0, %v341_v12 }
 0x3a2   :  { %451 = shalt.err (!%p448_p0)
}
 0x3a3   :  { %356 = dma.vmem_to_hbm [thread:$0]  %s354_s12, 64, %s604_s3, [#allocation7]  }
 0x3a4   :  { %462 = dma.done.wait [#allocation7], 64  }
 0x3a5   :  { %463 = vsyncadd [#allocation7], 4294967232 }
 0x3a6   :  { %464 = dma.done.wait [#allocation10], 64  }
 0x3a7   :  { %465 = vsyncadd [#allocation10], 4294967232 }
 0x3a8   :  { %381 = vsyncpa [#allocation6], 1 }
 0x3a9   :  { %382 = vsyncpa [#allocation7], 1 }
 0x3aa   :  { %383 = vsyncpa [#allocation10], 1 }

</bundles_post_ra>
